<compile_context>
chip_gen: v6e
topology: v6e:2x2x1
jax: 0.10.0
libtpu: 0.0.40
codegen_flags: <defaults>
</compile_context>

<pallas_src>
import functools

import jax
import jax.numpy as jnp
from jax.experimental import pallas as pl
from jax.experimental.pallas import tpu as pltpu

_MIB = 1024 * 1024


def _timestep_norm_kernel(x_ref, gamma_ref, beta_ref, o_ref, *, eps):
    # x_ref: (batch_tile, C, tile_t). Normalize over C (axis -2) per (b, t).
    x = x_ref[...].astype(jnp.float32)
    mean = jnp.mean(x, axis=-2, keepdims=True)          # (bt, 1, tt)
    xc = x - mean                                       # reused for var + output
    var = jnp.mean(xc * xc, axis=-2, keepdims=True)     # population variance
    # torch uses (std + eps) in the denominator; exact reciprocal on the small
    # reduced tensor, then a cheap VPU multiply on the full tile.
    inv = pl.reciprocal(jnp.sqrt(var) + eps, approx=False)
    g = gamma_ref[...].astype(jnp.float32)              # (1, C, 1)
    b = beta_ref[...].astype(jnp.float32)
    o_ref[...] = (g * (xc * inv) + b).astype(o_ref.dtype)


def _vmem_capacity_bytes():
    try:
        cap = getattr(pltpu.get_tpu_info(), "vmem_capacity_bytes", None)
        if cap:
            return int(cap)
    except Exception:
        pass
    return 64 * _MIB  # conservative (v7x per-TC) fallback


def _x_block_spec(shape, index_map, buffers):
    if buffers > 2:
        try:
            return pl.BlockSpec(shape, index_map, pipeline_mode=pl.Buffered(buffers))
        except Exception:
            pass  # older jax: fall back to default double-buffering
    return pl.BlockSpec(shape, index_map)


def timestep_norm(x, gamma, beta, eps=1e-4):
    """x: (B, C, T); gamma, beta broadcastable to (1, C, 1). Returns (B, C, T)."""
    B, C, T = x.shape
    io_itemsize = jnp.dtype(x.dtype).itemsize

    # ---- generation-aware budgets -------------------------------------------
    vmem_cap = _vmem_capacity_bytes()
    if vmem_cap >= 96 * _MIB:          # v5e / v6e: 128 MiB physical VMEM
        block_budget = 14 * _MIB       # io bytes per (batch_tile, C, tile_t) block
        vmem_ceiling = 96 * _MIB
        min_blocks = 2                 # 1 TC: just enough to pipeline
    else:                              # v7x: 64 MiB physical VMEM per TC
        block_budget = 7 * _MIB
        vmem_ceiling = 48 * _MIB
        min_blocks = 4                 # 2 TCs: give both cores work

    # ---- pick tile_t (lane axis): multiple of 128, bounded by block bytes ---
    if T >= 128:
        max_by_bytes = max(128, block_budget // (io_itemsize * C))
        tile_t = min(T, 8192, max_by_bytes)
        if tile_t < T:
            tile_t = max(128, (tile_t // 128) * 128)
    else:
        tile_t = T                      # tiny-T: keep the whole time axis

    # ---- pack batch elements when the (C, tile_t) slab is small -------------
    slab_bytes = max(1, C * tile_t * io_itemsize)
    batch_tile = max(1, min(B, block_budget // slab_bytes))

    # ---- megacore / pipelining: ensure enough parallel blocks ---------------
    def n_blocks(bt, tt):
        return pl.cdiv(B, bt) * pl.cdiv(T, tt)

    while n_blocks(batch_tile, tile_t) < min_blocks:
        if batch_tile > 1:
            batch_tile = max(1, batch_tile // 2)
        elif tile_t >= 256:
            tile_t = max(128, ((tile_t // 2) // 128) * 128)
        else:
            break

    # ---- VMEM accounting with the real I/O dtype + f32 temporaries ----------
    def vmem_needed(bt, tt, n_buf):
        elems = bt * C * tt
        io_block = elems * io_itemsize
        f32_tmp = 2 * elems * 4                          # x (f32 cast) + xc
        params = 2 * 2 * C * 4                           # gamma + beta buffers
        return 2 * n_buf * io_block + f32_tmp + params + 2 * _MIB

    while vmem_needed(batch_tile, tile_t, 2) > vmem_ceiling:
        if batch_tile > 1:
            batch_tile = max(1, batch_tile // 2)
        elif tile_t > 128 and T >= 128:
            tile_t = max(128, ((tile_t // 2) // 128) * 128)
        else:
            # TODO(synk): tile C across the grid (two-pass stats-then-normalize)
            # for extremely large num_features instead of failing loudly.
            raise ValueError(
                f"TimeStepNorm: C={C} too large to fit a ({batch_tile},{C},"
                f"{tile_t}) block within {vmem_ceiling // _MIB} MiB of VMEM.")

    grid = (pl.cdiv(B, batch_tile), pl.cdiv(T, tile_t))
    block_io_bytes = batch_tile * C * tile_t * io_itemsize
    n_steps = grid[0] * grid[1]
    n_buf = 2
    if (block_io_bytes < 2 * _MIB and n_steps >= 4
            and vmem_needed(batch_tile, tile_t, 3) <= vmem_ceiling):
        n_buf = 3                       # deeper buffering hides short-DMA latency

    vmem_limit = int(min(vmem_ceiling,
                         max(32 * _MIB, vmem_needed(batch_tile, tile_t, n_buf))))

    x_block = (batch_tile, C, tile_t)
    x_map = lambda bi, ti: (bi, 0, ti)
    gb_block = (1, C, 1)
    gb_map = lambda bi, ti: (0, 0, 0)

    gamma_r = jnp.reshape(gamma, (1, C, 1))
    beta_r = jnp.reshape(beta, (1, C, 1))

    kernel = functools.partial(_timestep_norm_kernel, eps=eps)
    return pl.pallas_call(
        kernel,
        out_shape=jax.ShapeDtypeStruct((B, C, T), x.dtype),
        grid_spec=pltpu.PrefetchScalarGridSpec(
            num_scalar_prefetch=0,
            grid=grid,
            in_specs=[
                _x_block_spec(x_block, x_map, n_buf),
                pl.BlockSpec(gb_block, gb_map),    # gamma: VMEM-resident
                pl.BlockSpec(gb_block, gb_map),    # beta
            ],
            out_specs=_x_block_spec(x_block, x_map, n_buf),
        ),
        compiler_params=pltpu.CompilerParams(
            dimension_semantics=("parallel", "parallel"),
            vmem_limit_bytes=vmem_limit,
        ),
    )(x, gamma_r, beta_r)


def timestep_norm_ref(x, gamma, beta, eps=1e-4):
    x = x.astype(jnp.float32)
    mean = jnp.mean(x, axis=1, keepdims=True)
    std = jnp.sqrt(jnp.mean((x - mean) ** 2, axis=1, keepdims=True))
    return (gamma.astype(jnp.float32) * ((x - mean) / (std + eps))
            + beta.astype(jnp.float32))


if __name__ == "__main__":
    key = jax.random.PRNGKey(0)

    # --- primary small test (matches the module's implied shapes) ------------
    B, C, T = 2, 4, 16
    x = jax.random.normal(key, (B, C, T), dtype=jnp.float32)
    gamma = jnp.ones((1, C, 1), dtype=jnp.float32)    # nn.Parameter(torch.ones)
    beta = jnp.zeros((1, C, 1), dtype=jnp.float32)    # nn.Parameter(torch.zeros)

    out = jax.block_until_ready(timestep_norm(x, gamma, beta, eps=1e-4))
    ref = timestep_norm_ref(x, gamma, beta, eps=1e-4)
    assert jnp.allclose(out, ref, atol=1e-5, rtol=1e-5), "mismatch (tiny-T path)"

    # --- lane-dense T-tiled path with batch packing / megacore split ---------
    B2, C2, T2 = 2, 16, 4096
    k2, k3 = jax.random.split(jax.random.PRNGKey(1))
    x2 = jax.random.normal(k2, (B2, C2, T2), dtype=jnp.float32)
    gamma2 = 1.0 + 0.1 * jax.random.normal(k3, (1, C2, 1), dtype=jnp.float32)
    beta2 = 0.1 * jnp.ones((1, C2, 1), dtype=jnp.float32)

    out2 = jax.block_until_ready(timestep_norm(x2, gamma2, beta2, eps=1e-4))
    ref2 = timestep_norm_ref(x2, gamma2, beta2, eps=1e-4)
    assert jnp.allclose(out2, ref2, atol=1e-5, rtol=1e-5), "mismatch (tiled path)"

    # --- bf16 I/O path (f32 internal math, dtype-aware block sizing) ---------
    B3, C3, T3 = 2, 8, 512
    x3 = jax.random.normal(jax.random.PRNGKey(2), (B3, C3, T3), dtype=jnp.bfloat16)
    gamma3 = jnp.ones((1, C3, 1), dtype=jnp.float32)
    beta3 = jnp.zeros((1, C3, 1), dtype=jnp.float32)

    out3 = jax.block_until_ready(timestep_norm(x3, gamma3, beta3, eps=1e-4))
    ref3 = timestep_norm_ref(x3, gamma3, beta3, eps=1e-4)
    assert jnp.allclose(out3.astype(jnp.float32), ref3, atol=5e-2, rtol=5e-2), \
        "mismatch (bf16 path)"

    print("KERNEL_OK")
</pallas_src>

<mosaic_0001>
module attributes {stable_mosaic.version = 11 : i64} {
  func.func @_timestep_norm_kernel(%arg0: i32, %arg1: i32, %arg2: memref<1x4x16xf32, #tpu.memory_space<vmem>>, %arg3: memref<1x4x1xf32, #tpu.memory_space<vmem>>, %arg4: memref<1x4x1xf32, #tpu.memory_space<vmem>>, %arg5: memref<1x4x16xf32, #tpu.memory_space<vmem>>) attributes {dimension_semantics = [#tpu.dimension_semantics<parallel>, #tpu.dimension_semantics<parallel>], iteration_bounds = array<i64: 2, 1>, scalar_prefetch = 0 : i64, scratch_operands = 0 : i64, tpu.core_type = #tpu.core_type<tc>, window_params = [{transform_indices = @transform_0, window_bounds = array<i64: 1, 4, 16>}, {pipeline_mode = #tpu.pipeline_mode<synchronous>, transform_indices = @transform_1, window_bounds = array<i64: 1, 4, 1>}, {pipeline_mode = #tpu.pipeline_mode<synchronous>, transform_indices = @transform_2, window_bounds = array<i64: 1, 4, 1>}, {transform_indices = @transform_3, window_bounds = array<i64: 1, 4, 16>}]} {
    %c0 = arith.constant 0 : index
    %c0_0 = arith.constant 0 : index
    %c0_1 = arith.constant 0 : index
    %0 = vector.load %arg2[%c0, %c0_0, %c0_1] : memref<1x4x16xf32, #tpu.memory_space<vmem>>, vector<1x4x16xf32>
    %cst = arith.constant dense<0.000000e+00> : vector<1x16xf32>
    %1 = vector.multi_reduction <add>, %0, %cst [1] : vector<1x4x16xf32> to vector<1x16xf32>
    %2 = vector.shape_cast %1 : vector<1x16xf32> to vector<1x1x16xf32>
    %cst_2 = arith.constant 4.000000e+00 : f32
    %3 = vector.broadcast %cst_2 : f32 to vector<1x1x16xf32>
    %4 = arith.divf %2, %3 : vector<1x1x16xf32>
    %5 = vector.broadcast %4 : vector<1x1x16xf32> to vector<1x4x16xf32>
    %6 = arith.subf %0, %5 : vector<1x4x16xf32>
    %7 = arith.mulf %6, %6 : vector<1x4x16xf32>
    %cst_3 = arith.constant dense<0.000000e+00> : vector<1x16xf32>
    %8 = vector.multi_reduction <add>, %7, %cst_3 [1] : vector<1x4x16xf32> to vector<1x16xf32>
    %9 = vector.shape_cast %8 : vector<1x16xf32> to vector<1x1x16xf32>
    %cst_4 = arith.constant 4.000000e+00 : f32
    %10 = vector.broadcast %cst_4 : f32 to vector<1x1x16xf32>
    %11 = arith.divf %9, %10 : vector<1x1x16xf32>
    %12 = math.sqrt %11 : vector<1x1x16xf32>
    %cst_5 = arith.constant 9.99999974E-5 : f32
    %13 = vector.broadcast %cst_5 : f32 to vector<1x1x16xf32>
    %14 = arith.addf %12, %13 : vector<1x1x16xf32>
    %15 = tpu.reciprocal %14 : vector<1x1x16xf32> -> vector<1x1x16xf32>
    %c0_6 = arith.constant 0 : index
    %c0_7 = arith.constant 0 : index
    %c0_8 = arith.constant 0 : index
    %16 = vector.load %arg3[%c0_6, %c0_7, %c0_8] : memref<1x4x1xf32, #tpu.memory_space<vmem>>, vector<1x4x1xf32>
    %c0_9 = arith.constant 0 : index
    %c0_10 = arith.constant 0 : index
    %c0_11 = arith.constant 0 : index
    %17 = vector.load %arg4[%c0_9, %c0_10, %c0_11] : memref<1x4x1xf32, #tpu.memory_space<vmem>>, vector<1x4x1xf32>
    %18 = vector.broadcast %15 : vector<1x1x16xf32> to vector<1x4x16xf32>
    %19 = arith.mulf %6, %18 : vector<1x4x16xf32>
    %20 = vector.broadcast %16 : vector<1x4x1xf32> to vector<1x4x16xf32>
    %21 = arith.mulf %20, %19 : vector<1x4x16xf32>
    %22 = vector.broadcast %17 : vector<1x4x1xf32> to vector<1x4x16xf32>
    %23 = arith.addf %21, %22 : vector<1x4x16xf32>
    %c0_12 = arith.constant 0 : index
    %c0_13 = arith.constant 0 : index
    %c0_14 = arith.constant 0 : index
    %24 = vector.load %arg5[%c0_12, %c0_13, %c0_14] : memref<1x4x16xf32, #tpu.memory_space<vmem>>, vector<1x4x16xf32>
    tpu.vector_store %arg5[%c0_12, %c0_13, %c0_14], %23 {strides = array<i32>} : memref<1x4x16xf32, #tpu.memory_space<vmem>>, vector<1x4x16xf32>,
    return
  }
  func.func @transform_0(%arg0: i32, %arg1: i32) -> (i32, i32, i32) {
    %c0_i32 = arith.constant 0 : i32
    %c0_i32_0 = arith.constant 0 : i32
    return %arg0, %c0_i32, %arg1 : i32, i32, i32
  }
  func.func @transform_1(%arg0: i32, %arg1: i32) -> (i32, i32, i32) {
    %c0_i32 = arith.constant 0 : i32
    %c0_i32_0 = arith.constant 0 : i32
    %c0_i32_1 = arith.constant 0 : i32
    %c0_i32_2 = arith.constant 0 : i32
    return %c0_i32, %c0_i32_0, %c0_i32_1 : i32, i32, i32
  }
  func.func @transform_2(%arg0: i32, %arg1: i32) -> (i32, i32, i32) {
    %c0_i32 = arith.constant 0 : i32
    %c0_i32_0 = arith.constant 0 : i32
    %c0_i32_1 = arith.constant 0 : i32
    %c0_i32_2 = arith.constant 0 : i32
    return %c0_i32, %c0_i32_0, %c0_i32_1 : i32, i32, i32
  }
  func.func @transform_3(%arg0: i32, %arg1: i32) -> (i32, i32, i32) {
    %c0_i32 = arith.constant 0 : i32
    %c0_i32_0 = arith.constant 0 : i32
    return %arg0, %c0_i32, %arg1 : i32, i32, i32
  }
}

</mosaic_0001>

<bundles_post_ra>
// kernel: tpu_custom_call.1
= control target key start
LH: loop header
LB: loop body
LE: loop exit
PB: predicated region body
PF: predicated region fallthrough
CT: control target
= control target key end

     0   :  { %8 = vsyncpa [#allocation3], 0  ;;  %s603_s0 = inlined_call_operand.vmem [shape: f32[2,4,16], index: 0, kind: input, shape index: {}]   ;;  %s604_s1 = inlined_call_operand.vmem [shape: f32[1,4,1], index: 1, kind: input, shape index: {}]   ;;  %s605_s2 = inlined_call_operand.vmem [shape: f32[1,4,1], index: 2, kind: input, shape index: {}]   ;;  %s606_s3 = inlined_call_operand.hbm [shape: f32[2,4,16], index: 3, kind: output, shape index: {}]  }
   0x1   :  { %10 = vsyncpa [#allocation3 + $0x1], 0  ;;  %s495_s12 = smov 0   ;;  %s497_s13 = smov 0  }
   0x2   :  { %s499_s14 = smov 0   ;;  %s501_s15 = smov 0  }
   0x3   :  { %s503_s16 = smov 0   ;;  %s505_s17 = smov 0  }
   0x4 LB: > { %s323_s18 = sadd.s32 4294967295, %s471_s17   ;;  %s324_s19 = sadd.s32 4294967294, %s471_s17   ;;  %s471_s17 = sphi %s505_s17, %s16_s17   ;;  %s467_s16 = sphi %s503_s16, %s613_s16   ;;  %s463_s15 = sphi %s501_s15, %s612_s15   ;;  %s459_s14 = sphi %s499_s14, %s611_s14   ;;  %s455_s13 = sphi %s497_s13, %s610_s13   ;;  %s451_s12 = sphi %s495_s12, %s609_s12  }
   0x5   : > { %s28_s20 = sadd.s32 1, %s467_s16  ;;  %s107_s21 = sadd.s32 1, %s459_s14 }
   0x6   : > { %p30_p0 = scmp.ge.s32.totalorder %s28_s20, 2  ;;  %p117_p1 = scmp.ne.s32.totalorder %s459_s14, %s455_s13 }
   0x7   : > { %p118_p2 = scmp.eq.s32.totalorder %s323_s18, 1  ;;  %p123_p3 = scmp.ne.s32.totalorder %s455_s13, %s451_s12 }
   0x8   : > { %s615_s20 = smov (%p30_p0, %s28_s20), 0  ;;  %p124_p5 = scmp.eq.s32.totalorder %s324_s19, 1 }
   0x9   : > { %p535_p4 = por %p118_p2, %p117_p1  ;;  %s102_s23 = ssub.s32 %s467_s16, %s615_s20 }
   0xa   : > { %p327_p6 = scmp.ge.s32.totalorder %s471_s17, 1  ;;  %p105_p7 = scmp.eq.s32.totalorder %s102_s23, 0 }
   0xb   : > { %p542_p8 = por %p124_p5, %p123_p3  ;;  %p158_p9 = scmp.lt.s32.totalorder %s471_s17, 3 }
   0xc   : > { %s548_s25 = scalar_select %p105_p7, %s459_s14, %s107_s21  }
   0xd   : > { %p159_p10 = pnand %p327_p6, %p158_p9 }
   0xe   : > { %p184_p11 = scmp.lt.s32.totalorder (!%p159_p10), %s463_s15, 1  ;;  %s181_s8 = sand.u32 (!%p159_p10), 1, %s455_s13  }
   0xf   : > { %162 = sbr.rel (%p159_p10) target bundleno = 165 (0xa5), region = 32  ;;  %s328_s9 = sshll.u32 (!%p159_p10), %s181_s8, 2 }
  0x10   : > { %s331_s10 = sshll.u32 (!%p159_p10), %s463_s15, 6  ;;  %s183_s11 = scalar_lea.vmem (!%p159_p10), [#allocation2], %s328_s9 }
  0x11   : > { %s252_s18 = sshll.u32 (!%p159_p10), %s183_s11, 4  ;;  %s250_s23 = scalar_lea.hbm (!%p159_p10), %s606_s3, %s331_s10  ;;  %s253_s18 = int_to_ptr.vmem [resolvable:$true] %s252_s18 }
  0x12   : > { %s238_s26 = scalar_lea.sflag (!%p159_p10), [#allocation3], %s181_s8  ;;  %s395_s27 = scalar_lea.vmem (!%p159_p10), %s253_s18, 64 }
  0x13   : > { %p396_p12 = scmp.ne.s32.totalorder (!%p159_p10), %s253_s18, %s395_s27 }
  0x14   : > { %v221_v0 = vld [vmem:[%s604_s1] sm:$0xf]  ;;  %v473_v1 = vmov 0   ;;  %s185_s28 = scalar_select %p184_p11, %s463_s15, 1  ;;  %vm192_vm0 = vcmask 125952  }
  0x15   : > { %390 = vset.pattern.permute.xlu0 %v473_v1  ;;  %v222_v2 = vld [vmem:[%s605_s2] sm:$0xf]  ;;  %p397_p13 = pnand %p396_p12, %p535_p4 }
  0x16   : > { %226 = vperm.xlu0 %390, %v221_v0   ;;  %s329_s4 = sshll.u32 %s185_s28, 2  ;;  %s474_s28 = smov [#allocation2]  }
  0x17   : > { %s190_s7 = scalar_lea.vmem %s603_s0, %s329_s4  ;;  %p398_p0 = pneg %p397_p13 }
  0x18   : > { %v191_v3 = vld [vmem:[%s190_s7] sm:$0xf]  ;;  %s399_s15 = sshll.u32 %s474_s28, 4  ;;  %s400_s15 = int_to_ptr.vmem [resolvable:$false] %s399_s15 }
  0x19   : > { %v193_v4 = vsel %vm192_vm0, %v191_v3, 0.0  ;;  %s401_s29 = scalar_lea.vmem %s400_s15, 128  ;;  %p402_p1 = scmp.lt.s32.totalorder %s253_s18, %s400_s15 }
  0x1a   : > { %232 = vperm.xlu0 %390, %v222_v2   ;;  %v194_v5 = vrot.slane %v193_v4, 4  ;;  %p403_p2 = scmp.lt.s32.totalorder %s401_s29, %s395_s27 }
  0x1c   : > { %v195_v6 = vadd.f32 %v194_v5, %v193_v4  ;;  %p404_p3 = por %p403_p2, %p402_p1 }
  0x1e   : > { %v196_v7 = vrot.slane %v195_v6, 2  ;;  %p405_p5 = pnand %p404_p3, %p398_p0 }
  0x20   : > { %v197_v8 = vadd.f32 %v196_v7, %v195_v6 }
  0x22   : > { %v198_v9 = vrot.slane %v197_v8, 1 }
  0x24   : > { %v199_v10 = vadd.f32 %v198_v9, %v197_v8 }
  0x26   : > { %v201_v11 = vmul.f32 0.25, %v199_v10 }
  0x28   : > { %v202_v12 = vsub.f32 %v191_v3, %v201_v11 }
  0x2a   : > { %v203_v13 = vmul.f32 %v202_v12, %v202_v12 }
  0x2c   : > { %v204_v14 = vsel %vm192_vm0, %v203_v13, 0.0 }
  0x2d   : > { %v205_v15 = vrot.slane %v204_v14, 4 }
  0x2f   : > { %v206_v16 = vadd.f32 %v205_v15, %v204_v14 }
  0x31   : > { %v207_v17 = vrot.slane %v206_v16, 2 }
  0x33   : > { %v208_v18 = vadd.f32 %v207_v17, %v206_v16 }
  0x35   : > { %v209_v19 = vrot.slane %v208_v18, 1 }
  0x37   : > { %v210_v20 = vadd.f32 %v209_v19, %v208_v18 }
  0x39   : > { %v211_v21 = vmul.f32 0.25, %v210_v20 }
  0x3b   : > { %391 = vrsqrt.f32 %v211_v21  ;;  %vm214_vm1 = vcmp.eq.f32.partialorder %v211_v21, inf  ;;  %v217_v24 = vand.u32 2147483648, %v211_v21  ;;  %vm216_vm2 = vcmp.eq.f32.partialorder %v211_v21, 0.0 }
  0x48   : > { %v392_v22 = vpop.eup %391 }
  0x49   : > { %v213_v23 = vmul.f32 %v392_v22, %v211_v21 }
  0x4b   : > { %v215_v25 = vsel %vm214_vm1, %v211_v21, %v213_v23 }
  0x4c   : > { %v218_v26 = vsel %vm216_vm2, %v217_v24, %v215_v25 }
  0x4d   : > { %v219_v27 = vadd.f32 0.0001, %v218_v26 }
  0x4f   : > { %393 = vrcp.f32 %v219_v27 }
  0x5c   : > { %v394_v28 = vpop.eup %393 }
  0x5d   : > { %v223_v29 = vmul.f32 %v394_v28, %v202_v12 }
  0x91   : > { %v227_v30 = vpop.permute.xlu0 %226 }
  0x92   : > { %v229_v31 = vmul.f32 %v227_v30, %v223_v29 }
  0x95   : > { %v233_v32 = vpop.permute.xlu0 %232 }
  0x96   : > { %v235_v33 = vadd.f32 %v233_v32, %v229_v31 }
  0x98   : > { %236 = vst.msk [vmem:[%s183_s11] sm:$0xf] %vm192_vm0, %v235_v33 }
  0x99   : > { %408 = shalt.err (!%p405_p5)
}
  0x9a   : > { %s409_s30 = scalar_lea.hbm %s250_s23, 64  ;;  %s413_s6 = scalar_lea.hbm %s606_s3, 128 }
  0x9b   : > { %p410_p6 = scmp.ne.s32.totalorder %s250_s23, %s409_s30  ;;  %p414_p10 = scmp.lt.s32.totalorder %s250_s23, %s606_s3 }
  0x9c   : > { %p415_p11 = scmp.lt.s32.totalorder %s413_s6, %s409_s30 }
  0x9d   : > { %p411_p7 = pnand %p410_p6, %p535_p4 }
  0x9e   : > { %p416_p12 = por %p415_p11, %p414_p10 }
  0x9f   : > { %p412_p9 = pneg %p411_p7 }
  0xa1   : > { %p417_p13 = pnand %p416_p12, %p412_p9 }
  0xa3   : > { %420 = shalt.err (!%p417_p13)
}
  0xa4   : > { %334 = dma.vmem_to_hbm [thread:$0]  (%p535_p4), %s253_s18, 64, %s250_s23, %s238_s26  }
  0xa5 PF: > { %p340_p0 = scmp.ge.s32.totalorder %s471_s17, 2  ;;  %s264_s9 = sand.u32 1, %s451_s12  }
  0xa6   : > { %s265_s10 = scalar_lea.sflag [#allocation3], %s264_s9 }
  0xa7   : > { %p337_p1 = pnand %p340_p0, %p542_p8 }
  0xa9   : > { %p338_p2 = pneg %p337_p1 }
  0xab   : > { %446 = dma.done.wait (%p338_p2), %s265_s10, 64  }
  0xac   : > { %448 = vsyncadd (%p338_p2), %s265_s10, 4294967232  ;;  %s16_s17 = sadd.s32 1, %s471_s17   ;;  %s609_s12 = smov %s455_s13 }
  0xad   : > { %p13_p3 = scmp.ge.s32.totalorder %s16_s17, 4   ;;  %s610_s13 = smov %s459_s14 }
  0xae   : > { %s611_s14 = smov %s548_s25  ;;  %s612_s15 = smov %s467_s16 }
  0xaf   : > { %s613_s16 = smov %s615_s20  ;;  %15 = sbr.rel (!%p13_p3) target bundleno = 4 (0x4), region = 67 }
  0xb4   :  { %270 = vsyncpa [#allocation3], 1 }
  0xb5   :  { %272 = vsyncpa [#allocation3 + $0x1], 1 }

</bundles_post_ra>
